<compile_context>
chip_gen: v7x
topology: tpu7x:2x2x1
jax: 0.10.0
libtpu: 0.0.40
codegen_flags: <defaults>
</compile_context>

<pallas_src>
import functools
import math

import jax
import jax.numpy as jnp
import numpy as np
from jax import lax
from jax.experimental import pallas as pl
from jax.experimental.pallas import tpu as pltpu


def _lpc_synth_kernel(xT_ref, gain_ref, aT_ref, win_ref, out_ref, *, p, W, BLK):
  """Per-frame IIR LPC synthesis + in-kernel windowing (lane-dense output).

  xT_ref:   (W, TF)   excitation frames, time on sublanes / frames on lanes
  gain_ref: (1, TF)   per-frame gain
  aT_ref:   (p, TF)   per-frame AR coefficients
  win_ref:  (W, 1)    synthesis window
  out_ref:  (W, TF)   win[n] * y[n] per frame
  """
  TF = xT_ref.shape[1]

  # Hoist coefficient loads out of the time loop: they stay resident in vregs
  # for the whole recursion.
  gain = gain_ref[...]                               # (1, TF)
  aT = aT_ref[...]                                   # (p, TF)
  a = [aT[k:k + 1, :] for k in range(p)]             # p x (1, TF)

  nblk = W // BLK

  def block_step(b, carry):
    # carry = (y[n-1], y[n-2], ..., y[n-p]), each (1, TF), in registers.
    base = pl.multiple_of(b * BLK, BLK)
    xblk = xT_ref[pl.ds(base, BLK), :]               # (BLK, TF) aligned load
    wblk = win_ref[pl.ds(base, BLK), :]              # (BLK, 1)
    rows = []
    for j in range(BLK):                             # static unroll
      acc = gain * xblk[j:j + 1, :]
      for k in range(p):                             # p is static -> unrolled
        acc = acc - a[k] * carry[k]
      rows.append(acc)
      carry = (acc,) + carry[:-1]                    # rotate register carry
    yblk = jnp.concatenate(rows, axis=0)             # (BLK, TF)
    out_ref[pl.ds(base, BLK), :] = wblk * yblk       # batched unmasked store
    return carry

  carry0 = tuple(jnp.zeros((1, TF), jnp.float32) for _ in range(p))
  lax.fori_loop(0, nblk, block_step, carry0)


def lpc_synth_forward(ex, lpc, hop_length, window_size=None):
  """JAX/Pallas equivalent of LPCSynth.forward(ex, lpc)."""
  ex = jnp.asarray(ex, jnp.float32)
  lpc = jnp.asarray(lpc, jnp.float32)
  assert ex.ndim == 1 and lpc.ndim == 2

  hop = int(hop_length)
  W = hop * 4 if window_size is None else int(window_size)
  pad = (W - hop) // 2
  # TODO(synk): general window_size not a multiple of hop_length would need a
  # different OLA decomposition; the module default (W = 4*hop) satisfies this.
  assert W % hop == 0, "OLA decomposition assumes hop_length divides window_size"
  r = W // hop

  # periodic Hann window (matches torch.hann_window default)
  n = jnp.arange(W, dtype=jnp.float32)
  win = 0.5 - 0.5 * jnp.cos(2.0 * jnp.pi * n / W)

  # F.pad + unfold (glue)
  ex_p = jnp.pad(ex, (pad, pad))
  n_frames = (ex_p.shape[0] - W) // hop + 1
  assert n_frames == lpc.shape[0], f"{n_frames} != {lpc.shape[0]}"
  idx = jnp.arange(n_frames)[:, None] * hop + jnp.arange(W)[None, :]
  unfolded = ex_p[idx]                                 # (n_frames, W)

  xT = unfolded.T                                      # (W, n_frames)
  gain = lpc[:, :1].T                                  # (1, n_frames)
  aT = lpc[:, 1:].T                                    # (p, n_frames)
  p = int(aT.shape[0])
  assert p >= 1, "expected at least one AR coefficient (lpc order >= 2)"

  # --- pad frames to a lane multiple and pick a frame tile -----------------
  LANE = 128
  nf_pad = ((n_frames + LANE - 1) // LANE) * LANE
  TF = 128
  for cand in (512, 384, 256, 128):                    # largest tile dividing nf_pad
    if nf_pad % cand == 0:
      TF = cand
      break
  pad_f = nf_pad - n_frames
  xT_p = jnp.pad(xT, ((0, 0), (0, pad_f)))
  gain_p = jnp.pad(gain, ((0, 0), (0, pad_f)))
  aT_p = jnp.pad(aT, ((0, 0), (0, pad_f)))

  BLK = math.gcd(W, 8)                                 # time-block of rows per store

  kernel = functools.partial(_lpc_synth_kernel, p=p, W=W, BLK=BLK)

  wy = pl.pallas_call(
      kernel,
      out_shape=jax.ShapeDtypeStruct((W, nf_pad), jnp.float32),
      grid=(nf_pad // TF,),
      in_specs=[
          pl.BlockSpec((W, TF), lambda i: (0, i)),
          pl.BlockSpec((1, TF), lambda i: (0, i)),
          pl.BlockSpec((p, TF), lambda i: (0, i)),
          pl.BlockSpec((W, 1), lambda i: (0, 0)),
      ],
      out_specs=pl.BlockSpec((W, TF), lambda i: (0, i)),
      compiler_params=pltpu.CompilerParams(
          dimension_semantics=("parallel",)),
  )(xT_p, gain_p, aT_p, win.reshape(W, 1))

  wy = wy[:, :n_frames]                                # crop frame padding

  # --- shifted overlap-add (r cheap adds) + input-independent norm ---------
  frames = wy.T                                        # (n_frames, W) windowed
  M = n_frames + r - 1
  full_chunks = jnp.zeros((M, hop), jnp.float32)
  norm_chunks = jnp.zeros((M, hop), jnp.float32)
  for s in range(r):
    full_chunks = full_chunks.at[s:s + n_frames].add(
        frames[:, s * hop:(s + 1) * hop])
    norm_chunks = norm_chunks.at[s:s + n_frames].add(
        jnp.broadcast_to(win[s * hop:(s + 1) * hop][None, :], (n_frames, hop)))
  full = full_chunks.reshape(-1)                       # length M*hop
  norm = norm_chunks.reshape(-1)
  L_out = (n_frames - 1) * hop + W - 2 * pad
  return full[pad:pad + L_out] / norm[pad:pad + L_out]


def _reference_numpy(ex, lpc, hop, W):
  """Pure-numpy re-implementation of the PyTorch forward (for checking)."""
  ex = np.asarray(ex, np.float32)
  lpc = np.asarray(lpc, np.float32)
  pad = (W - hop) // 2
  ex_p = np.pad(ex, (pad, pad))
  n_frames = (len(ex_p) - W) // hop + 1
  frames = np.stack([ex_p[i * hop:i * hop + W] for i in range(n_frames)])
  gain, a = lpc[:, 0], lpc[:, 1:]
  p = a.shape[1]
  y = np.zeros_like(frames)
  for nn in range(W):
    acc = gain * frames[:, nn]
    for k in range(1, p + 1):
      if nn - k >= 0:
        acc = acc - a[:, k - 1] * y[:, nn - k]
    y[:, nn] = acc
  win = (0.5 - 0.5 * np.cos(2.0 * np.pi * np.arange(W) / W)).astype(np.float32)
  Lfull = (n_frames - 1) * hop + W
  full = np.zeros(Lfull, np.float32)
  norm = np.zeros(Lfull, np.float32)
  for i in range(n_frames):
    full[i * hop:i * hop + W] += y[i] * win
    norm[i * hop:i * hop + W] += win
  L_out = (n_frames - 1) * hop + W - 2 * pad
  return full[pad:pad + L_out] / norm[pad:pad + L_out]


if __name__ == "__main__":
  key = jax.random.PRNGKey(0)
  hop = 8
  T = 128
  W = hop * 4                      # default window_size = 4 * hop_length
  order = 5                        # lpc[:, 0] = gain, lpc[:, 1:] = 4 AR coeffs
  pad = (W - hop) // 2
  n_frames = (T + 2 * pad - W) // hop + 1   # 16

  k1, k2, k3 = jax.random.split(key, 3)
  ex = jax.random.normal(k1, (T,), jnp.float32)
  gain = jax.random.uniform(k2, (n_frames, 1), jnp.float32, 0.5, 1.5)
  a = jax.random.uniform(k3, (n_frames, order - 1), jnp.float32, -0.2, 0.2)
  lpc = jnp.concatenate([gain, a], axis=1)  # (16, 5)

  y = lpc_synth_forward(ex, lpc, hop)
  y = jax.block_until_ready(y)

  ref = _reference_numpy(np.asarray(ex), np.asarray(lpc), hop, W)
  np.testing.assert_allclose(np.asarray(y), ref, rtol=1e-4, atol=1e-4)

  print("KERNEL_OK")
</pallas_src>

<mosaic_0001>
module attributes {stable_mosaic.version = 11 : i64} {
  func.func @_lpc_synth_kernel(%arg0: i32, %arg1: memref<32x128xf32, #tpu.memory_space<vmem>>, %arg2: memref<1x128xf32, #tpu.memory_space<vmem>>, %arg3: memref<4x128xf32, #tpu.memory_space<vmem>>, %arg4: memref<32x1xf32, #tpu.memory_space<vmem>>, %arg5: memref<32x128xf32, #tpu.memory_space<vmem>>) attributes {dimension_semantics = [#tpu.dimension_semantics<parallel>], iteration_bounds = array<i64: 1>, scalar_prefetch = 0 : i64, scratch_operands = 0 : i64, tpu.core_type = #tpu.core_type<tc>, window_params = [{transform_indices = @transform_0, window_bounds = array<i64: 32, 128>}, {transform_indices = @transform_1, window_bounds = array<i64: 1, 128>}, {transform_indices = @transform_2, window_bounds = array<i64: 4, 128>}, {pipeline_mode = #tpu.pipeline_mode<synchronous>, transform_indices = @transform_3, window_bounds = array<i64: 32, 1>}, {transform_indices = @transform_4, window_bounds = array<i64: 32, 128>}]} {
    %c0 = arith.constant 0 : index
    %c0_0 = arith.constant 0 : index
    %0 = vector.load %arg2[%c0, %c0_0] : memref<1x128xf32, #tpu.memory_space<vmem>>, vector<1x128xf32>
    %c0_1 = arith.constant 0 : index
    %c0_2 = arith.constant 0 : index
    %1 = vector.load %arg3[%c0_1, %c0_2] : memref<4x128xf32, #tpu.memory_space<vmem>>, vector<4x128xf32>
    %2 = vector.extract_strided_slice %1 {offsets = [0, 0], sizes = [1, 128], strides = [1, 1]} : vector<4x128xf32> to vector<1x128xf32>
    %3 = vector.extract_strided_slice %1 {offsets = [1, 0], sizes = [1, 128], strides = [1, 1]} : vector<4x128xf32> to vector<1x128xf32>
    %4 = vector.extract_strided_slice %1 {offsets = [2, 0], sizes = [1, 128], strides = [1, 1]} : vector<4x128xf32> to vector<1x128xf32>
    %5 = vector.extract_strided_slice %1 {offsets = [3, 0], sizes = [1, 128], strides = [1, 1]} : vector<4x128xf32> to vector<1x128xf32>
    %cst = arith.constant 0.000000e+00 : f32
    %6 = vector.broadcast %cst : f32 to vector<1x128xf32>
    %cst_3 = arith.constant 0.000000e+00 : f32
    %7 = vector.broadcast %cst_3 : f32 to vector<1x128xf32>
    %cst_4 = arith.constant 0.000000e+00 : f32
    %8 = vector.broadcast %cst_4 : f32 to vector<1x128xf32>
    %cst_5 = arith.constant 0.000000e+00 : f32
    %9 = vector.broadcast %cst_5 : f32 to vector<1x128xf32>
    %c0_i32 = arith.constant 0 : i32
    %c4_i32 = arith.constant 4 : i32
    %10 = arith.addi %c0_i32, %c4_i32 : i32
    %c1_i32 = arith.constant 1 : i32
    %11:4 = scf.for %arg6 = %c0_i32 to %10 step %c1_i32 iter_args(%arg7 = %6, %arg8 = %7, %arg9 = %8, %arg10 = %9) -> (vector<1x128xf32>, vector<1x128xf32>, vector<1x128xf32>, vector<1x128xf32>)  : i32 {
      %c8_i32 = arith.constant 8 : i32
      %12 = arith.muli %arg6, %c8_i32 : i32
      %13 = tpu.assume_multiple %12, 8 : i32
      %14 = arith.index_cast %13 : i32 to index
      %c0_7 = arith.constant 0 : index
      %15 = vector.load %arg1[%14, %c0_7] : memref<32x128xf32, #tpu.memory_space<vmem>>, vector<8x128xf32>
      %16 = arith.index_cast %13 : i32 to index
      %c0_8 = arith.constant 0 : index
      %17 = vector.load %arg4[%16, %c0_8] : memref<32x1xf32, #tpu.memory_space<vmem>>, vector<8x1xf32>
      %18 = vector.extract_strided_slice %15 {offsets = [0, 0], sizes = [1, 128], strides = [1, 1]} : vector<8x128xf32> to vector<1x128xf32>
      %19 = arith.mulf %0, %18 : vector<1x128xf32>
      %20 = arith.mulf %2, %arg7 : vector<1x128xf32>
      %21 = arith.subf %19, %20 : vector<1x128xf32>
      %22 = arith.mulf %3, %arg8 : vector<1x128xf32>
      %23 = arith.subf %21, %22 : vector<1x128xf32>
      %24 = arith.mulf %4, %arg9 : vector<1x128xf32>
      %25 = arith.subf %23, %24 : vector<1x128xf32>
      %26 = arith.mulf %5, %arg10 : vector<1x128xf32>
      %27 = arith.subf %25, %26 : vector<1x128xf32>
      %28 = vector.extract_strided_slice %15 {offsets = [1, 0], sizes = [1, 128], strides = [1, 1]} : vector<8x128xf32> to vector<1x128xf32>
      %29 = arith.mulf %0, %28 : vector<1x128xf32>
      %30 = arith.mulf %2, %27 : vector<1x128xf32>
      %31 = arith.subf %29, %30 : vector<1x128xf32>
      %32 = arith.mulf %3, %arg7 : vector<1x128xf32>
      %33 = arith.subf %31, %32 : vector<1x128xf32>
      %34 = arith.mulf %4, %arg8 : vector<1x128xf32>
      %35 = arith.subf %33, %34 : vector<1x128xf32>
      %36 = arith.mulf %5, %arg9 : vector<1x128xf32>
      %37 = arith.subf %35, %36 : vector<1x128xf32>
      %38 = vector.extract_strided_slice %15 {offsets = [2, 0], sizes = [1, 128], strides = [1, 1]} : vector<8x128xf32> to vector<1x128xf32>
      %39 = arith.mulf %0, %38 : vector<1x128xf32>
      %40 = arith.mulf %2, %37 : vector<1x128xf32>
      %41 = arith.subf %39, %40 : vector<1x128xf32>
      %42 = arith.mulf %3, %27 : vector<1x128xf32>
      %43 = arith.subf %41, %42 : vector<1x128xf32>
      %44 = arith.mulf %4, %arg7 : vector<1x128xf32>
      %45 = arith.subf %43, %44 : vector<1x128xf32>
      %46 = arith.mulf %5, %arg8 : vector<1x128xf32>
      %47 = arith.subf %45, %46 : vector<1x128xf32>
      %48 = vector.extract_strided_slice %15 {offsets = [3, 0], sizes = [1, 128], strides = [1, 1]} : vector<8x128xf32> to vector<1x128xf32>
      %49 = arith.mulf %0, %48 : vector<1x128xf32>
      %50 = arith.mulf %2, %47 : vector<1x128xf32>
      %51 = arith.subf %49, %50 : vector<1x128xf32>
      %52 = arith.mulf %3, %37 : vector<1x128xf32>
      %53 = arith.subf %51, %52 : vector<1x128xf32>
      %54 = arith.mulf %4, %27 : vector<1x128xf32>
      %55 = arith.subf %53, %54 : vector<1x128xf32>
      %56 = arith.mulf %5, %arg7 : vector<1x128xf32>
      %57 = arith.subf %55, %56 : vector<1x128xf32>
      %58 = vector.extract_strided_slice %15 {offsets = [4, 0], sizes = [1, 128], strides = [1, 1]} : vector<8x128xf32> to vector<1x128xf32>
      %59 = arith.mulf %0, %58 : vector<1x128xf32>
      %60 = arith.mulf %2, %57 : vector<1x128xf32>
      %61 = arith.subf %59, %60 : vector<1x128xf32>
      %62 = arith.mulf %3, %47 : vector<1x128xf32>
      %63 = arith.subf %61, %62 : vector<1x128xf32>
      %64 = arith.mulf %4, %37 : vector<1x128xf32>
      %65 = arith.subf %63, %64 : vector<1x128xf32>
      %66 = arith.mulf %5, %27 : vector<1x128xf32>
      %67 = arith.subf %65, %66 : vector<1x128xf32>
      %68 = vector.extract_strided_slice %15 {offsets = [5, 0], sizes = [1, 128], strides = [1, 1]} : vector<8x128xf32> to vector<1x128xf32>
      %69 = arith.mulf %0, %68 : vector<1x128xf32>
      %70 = arith.mulf %2, %67 : vector<1x128xf32>
      %71 = arith.subf %69, %70 : vector<1x128xf32>
      %72 = arith.mulf %3, %57 : vector<1x128xf32>
      %73 = arith.subf %71, %72 : vector<1x128xf32>
      %74 = arith.mulf %4, %47 : vector<1x128xf32>
      %75 = arith.subf %73, %74 : vector<1x128xf32>
      %76 = arith.mulf %5, %37 : vector<1x128xf32>
      %77 = arith.subf %75, %76 : vector<1x128xf32>
      %78 = vector.extract_strided_slice %15 {offsets = [6, 0], sizes = [1, 128], strides = [1, 1]} : vector<8x128xf32> to vector<1x128xf32>
      %79 = arith.mulf %0, %78 : vector<1x128xf32>
      %80 = arith.mulf %2, %77 : vector<1x128xf32>
      %81 = arith.subf %79, %80 : vector<1x128xf32>
      %82 = arith.mulf %3, %67 : vector<1x128xf32>
      %83 = arith.subf %81, %82 : vector<1x128xf32>
      %84 = arith.mulf %4, %57 : vector<1x128xf32>
      %85 = arith.subf %83, %84 : vector<1x128xf32>
      %86 = arith.mulf %5, %47 : vector<1x128xf32>
      %87 = arith.subf %85, %86 : vector<1x128xf32>
      %88 = vector.extract_strided_slice %15 {offsets = [7, 0], sizes = [1, 128], strides = [1, 1]} : vector<8x128xf32> to vector<1x128xf32>
      %89 = arith.mulf %0, %88 : vector<1x128xf32>
      %90 = arith.mulf %2, %87 : vector<1x128xf32>
      %91 = arith.subf %89, %90 : vector<1x128xf32>
      %92 = arith.mulf %3, %77 : vector<1x128xf32>
      %93 = arith.subf %91, %92 : vector<1x128xf32>
      %94 = arith.mulf %4, %67 : vector<1x128xf32>
      %95 = arith.subf %93, %94 : vector<1x128xf32>
      %96 = arith.mulf %5, %57 : vector<1x128xf32>
      %97 = arith.subf %95, %96 : vector<1x128xf32>
      %98 = tpu.concatenate %27, %37, %47, %57, %67, %77, %87, %97 in 0 : vector<1x128xf32>, vector<1x128xf32>, vector<1x128xf32>, vector<1x128xf32>, vector<1x128xf32>, vector<1x128xf32>, vector<1x128xf32>, vector<1x128xf32> -> vector<8x128xf32>
      %99 = vector.broadcast %17 : vector<8x1xf32> to vector<8x128xf32>
      %100 = arith.mulf %99, %98 : vector<8x128xf32>
      %101 = arith.index_cast %13 : i32 to index
      %c0_9 = arith.constant 0 : index
      %102 = vector.load %arg5[%101, %c0_9] : memref<32x128xf32, #tpu.memory_space<vmem>>, vector<8x128xf32>
      tpu.vector_store %arg5[%101, %c0_9], %100 {strides = array<i32>} : memref<32x128xf32, #tpu.memory_space<vmem>>, vector<8x128xf32>,
      scf.yield %97, %87, %77, %67 : vector<1x128xf32>, vector<1x128xf32>, vector<1x128xf32>, vector<1x128xf32>
    }
    %c4_i32_6 = arith.constant 4 : i32
    return
  }
  func.func @transform_0(%arg0: i32) -> (i32, i32) {
    %c0_i32 = arith.constant 0 : i32
    %c0_i32_0 = arith.constant 0 : i32
    return %c0_i32, %arg0 : i32, i32
  }
  func.func @transform_1(%arg0: i32) -> (i32, i32) {
    %c0_i32 = arith.constant 0 : i32
    %c0_i32_0 = arith.constant 0 : i32
    return %c0_i32, %arg0 : i32, i32
  }
  func.func @transform_2(%arg0: i32) -> (i32, i32) {
    %c0_i32 = arith.constant 0 : i32
    %c0_i32_0 = arith.constant 0 : i32
    return %c0_i32, %arg0 : i32, i32
  }
  func.func @transform_3(%arg0: i32) -> (i32, i32) {
    %c0_i32 = arith.constant 0 : i32
    %c0_i32_0 = arith.constant 0 : i32
    %c0_i32_1 = arith.constant 0 : i32
    return %c0_i32, %c0_i32_0 : i32, i32
  }
  func.func @transform_4(%arg0: i32) -> (i32, i32) {
    %c0_i32 = arith.constant 0 : i32
    %c0_i32_0 = arith.constant 0 : i32
    return %c0_i32, %arg0 : i32, i32
  }
}

</mosaic_0001>

<bundles_post_ra>
// kernel: tpu_custom_call.1
= control target key start
LH: loop header
LB: loop body
LE: loop exit
PB: predicated region body
PF: predicated region fallthrough
CT: control target
= control target key end

     0   :  { %9 = vsyncpa [#allocation3], 0  ;;  %s891_s0 = inlined_call_operand.vmem [shape: f32[32,128], index: 0, kind: input, shape index: {}]   ;;  %s892_s1 = inlined_call_operand.hbm [shape: f32[1,128], index: 1, kind: input, shape index: {}]   ;;  %s893_s2 = inlined_call_operand.vmem [shape: f32[4,128], index: 2, kind: input, shape index: {}]   ;;  %s894_s3 = inlined_call_operand.vmem [shape: f32[32,1], index: 3, kind: input, shape index: {}]   ;;  %s895_s4 = inlined_call_operand.hbm [shape: f32[32,128], index: 4, kind: output, shape index: {}]  }
   0x1   :  { %10 = vsyncpa [#allocation4], 0  ;;  %s689_s15 = smov [#allocation2]   ;;  %s601_s19 = scalar_lea.hbm %s892_s1, 16 }
   0x2   :  { %s19_s16 = sshll.u32 %s689_s15, 4  ;;  %p602_p0 = scmp.ne.s32.totalorder %s892_s1, %s601_s19  ;;  %s20_s16 = int_to_ptr.vmem [resolvable:$true] %s19_s16 }
   0x3   :  { %p605_p1 = scmp.lt.u32.totalorder %s601_s19, %s892_s1 }
   0x5   :  { %p607_p2 = pnand %p605_p1, %p602_p0 }
   0x7   :  { %610 = shalt.err (!%p607_p2)
}
   0x8   :  { %s611_s24 = scalar_lea.vmem %s20_s16, 16  ;;  %s615_s25 = scalar_lea.vmem %s20_s16, 32 }
   0x9   :  { %p612_p3 = scmp.ne.s32.totalorder %s20_s16, %s611_s24  ;;  %p616_p4 = scmp.lt.s32.totalorder %s20_s16, %s20_s16 }
   0xa   :  { %p617_p5 = scmp.lt.s32.totalorder %s615_s25, %s611_s24 }
   0xc   :  { %p618_p6 = por %p617_p5, %p616_p4 }
   0xe   :  { %p619_p7 = pnand %p618_p6, %p612_p3 }
  0x10   :  { %622 = shalt.err (!%p619_p7)
}
  0x11   :  { %22 = dma.hbm_to_vmem [thread:$0]  %s892_s1, 16, %s20_s16, [#allocation3]  }
  0x12   :  { %665 = dma.done.wait [#allocation3], 16  }
  0x13   :  { %666 = vsyncadd [#allocation3], 4294967280  ;;  %v732_v0 = vld [vmem:[#allocation2] sm:$0x1]  ;;  %v739_v2 = vmov 0.0   ;;  %v741_v3 = vmov 0.0  }
  0x14   :  { %v737_v1 = vld [vmem:[%s893_s2] sm:$0xf]  ;;  %v743_v4 = vmov 0.0   ;;  %v745_v5 = vmov 0.0   ;;  %s747_s30 = smov 0  }
  0x15 LB: > { %v51_v6 = vlaneseq  ;;  %v690_v7 = vmov 0   ;;  %v691_v8 = vmov 1966171168   ;;  %s757_s1 = sshll.u32 %s687_s30, 3  ;;  %v48_v21 = vmul.f32 %v683_v5, %v737_v1  ;;  %s37_s30 = sadd.s32 1, %s687_s30   ;;  %s687_s30 = sphi %s747_s30, %s37_s30   ;;  %v683_v5 = vphi %v745_v5, %v477_v5   ;;  %v679_v4 = vphi %v743_v4, %v441_v4   ;;  %v675_v3 = vphi %v741_v3, %v398_v3   ;;  %v671_v2 = vphi %v739_v2, %v838_v2  }
  0x16   : > { %599 = vset.pattern.permute.xlu0 %v690_v7  ;;  %v59_v9 = vunpack.c.l.s4 %v691_v8  ;;  %s45_s6 = scalar_lea.vmem %s894_s3, %s757_s1  ;;  %s43_s9 = scalar_lea.vmem %s891_s0, %s757_s1  ;;  %vm490_vm0 = vcmask 1040384   ;;  %vm492_vm1 = vcmask 1041408   ;;  %vm494_vm2 = vcmask 1042432  }
  0x17   : > { %v52_v10 = vshrl.u32 %v51_v6, 7  ;;  %v46_v12 = vld [vmem:[%s45_s6] sm:$0xff]  ;;  %vm496_vm3 = vcmask 1043456   ;;  %vm498_vm4 = vcmask 1044480   ;;  %vm500_vm5 = vcmask 1045504   ;;  %s510_s10 = scalar_lea.vmem [#allocation5], %s757_s1 }
  0x18   : > { %v60_v11 = vunpack.c.0.s8 %v59_v9  ;;  %v769_v14 = vld [vmem:[%s43_s9] sm:$0xff]  ;;  %506 = vperm.xlu0 %599, %v46_v12   ;;  %vm502_vm6 = vcmask 1046528   ;;  %p34_p8 = scmp.ge.s32.totalorder %s37_s30, 4  }
  0x19   : > { %v767_v13 = vsub.s32 0, %v52_v10  ;;  %v47_v20 = vmul.f32 %v769_v14, %v732_v0  ;;  %s692_s11 = smov (%p34_p8), [#allocation5]  }
  0x1a   : > { %v771_v15 = vsub.s32 %v60_v11, %v52_v10  ;;  %s517_s12 = sshll.u32 (%p34_p8), %s692_s11, 4  ;;  %s518_s12 = int_to_ptr.vmem [resolvable:$true] %s517_s12 }
  0x1b   : > { %v54_v16 = vrot.slane %v679_v4, %v767_v13  ;;  %v86_v17 = vrot.slane %v675_v3, %v767_v13  ;;  %v111_v18 = vrot.slane %v671_v2, %v767_v13  ;;  %v164_v19 = vrot.slane %v683_v5, %v767_v13  ;;  %s623_s13 = scalar_lea.vmem (%p34_p8), %s518_s12, 512  ;;  %p628_p10 = scmp.lt.s32.totalorder (%p34_p8), %s518_s12, %s518_s12 }
  0x1c   : > { %v140_v25 = vrot.slane %v769_v14, %v771_v15  ;;  %v49_v30 = vsub.f32 %v47_v20, %v48_v21  ;;  %p624_p9 = scmp.ne.s32.totalorder (%p34_p8), %s518_s12, %s623_s13  ;;  %p629_p11 = scmp.lt.s32.totalorder (%p34_p8), %s623_s13, %s623_s13 }
  0x1d   : > { %v56_v22 = vmul.f32 %v54_v16, %v737_v1  ;;  %v88_v23 = vmul.f32 %v86_v17, %v737_v1  ;;  %v113_v24 = vmul.f32 %v111_v18, %v737_v1  ;;  %v166_v29 = vmul.f32 %v164_v19, %v737_v1 }
  0x1e   : > { %v141_v34 = vcombine.high %v140_v25, %v140_v25  ;;  %v148_v48 = vrot.slane %v140_v25, %v771_v15  ;;  %v292_v18 = vcombine.high %v769_v14, %v769_v14  ;;  %p630_p12 = por (%p34_p8), %p629_p11, %p628_p10 }
  0x1f   : > { %v64_v26 = vrot.slane %v56_v22, %v771_v15  ;;  %v96_v27 = vrot.slane %v88_v23, %v771_v15  ;;  %v121_v28 = vrot.slane %v113_v24, %v771_v15  ;;  %v174_v38 = vrot.slane %v166_v29, %v771_v15 }
  0x20   : > { %v155_v41 = vrot.slane %v141_v34, %v771_v15  ;;  %v206_v58 = vcombine.high %v148_v48, %v148_v48  ;;  %v299_v24 = vrot.slane %v292_v18, %v771_v15  ;;  %p631_p13 = pnand (%p34_p8), %p630_p12, %p624_p9 }
  0x21   : > { %v65_v31 = vcombine.high %v64_v26, %v64_v26  ;;  %v103_v32 = vrot.slane %v96_v27, %v771_v15  ;;  %v122_v33 = vcombine.high %v121_v28, %v121_v28  ;;  %v175_v43 = vcombine.high %v174_v38, %v174_v38 }
  0x22   : > { %v195_v44 = vcombine.high %v96_v27, %v96_v27  ;;  %v72_v45 = vrot.slane %v64_v26, %v771_v15  ;;  %v157_v47 = vmul.f32 %v155_v41, %v732_v0  ;;  %v182_v62 = vrot.slane %v174_v38, %v771_v15 }
  0x23   : > { %v79_v35 = vrot.slane %v65_v31, %v771_v15  ;;  %v104_v36 = vcombine.high %v103_v32, %v103_v32  ;;  %v129_v37 = vrot.slane %v122_v33, %v771_v15  ;;  %v189_v50 = vrot.slane %v175_v43, %v771_v15 }
  0x24   : > { %v202_v51 = vrot.slane %v195_v44, %v771_v15  ;;  %v192_v54 = vcombine.high %v72_v45, %v72_v45  ;;  %v208_v2 = vmul.f32 %v206_v58, %v732_v0  ;;  %v243_v7 = vcombine.high %v182_v62, %v182_v62 }
  0x25   : > { %v81_v39 = vsub.f32 %v49_v30, %v79_v35  ;;  %v130_v40 = vcombine.high %v129_v37, %v129_v37  ;;  %v246_v10 = vcombine.high %v79_v35, %v79_v35  ;;  %v249_v11 = vcombine.high %v155_v41, %v155_v41 }
  0x26   : > { %v203_v57 = vcombine.high %v202_v51, %v202_v51  ;;  %v289_v29 = vcombine.high %v189_v50, %v189_v50  ;;  %v306_v30 = vrot.slane %v299_v24, %v771_v15  ;;  %v349_v43 = vcombine.high %v299_v24, %v299_v24 }
  0x27   : > { %v106_v42 = vsub.f32 %v81_v39, %v104_v36  ;;  %v251_v21 = vmul.f32 %v249_v11, %v732_v0 }
  0x28   : > { %v308_v35 = vmul.f32 %v306_v30, %v732_v0  ;;  %v356_v48 = vrot.slane %v349_v43, %v771_v15  ;;  %v399_v62 = vcombine.high %v306_v30, %v306_v30 }
  0x29   : > { %v795_v46 = vsub.f32 %v106_v42, %v130_v40 }
  0x2b   : > { %v158_v49 = vmul.f32 %v795_v46, %v737_v1  ;;  %v215_v52 = vrot.slane %v795_v46, %v767_v13 }
  0x2d   : > { %v159_v53 = vsub.f32 %v157_v47, %v158_v49  ;;  %v217_v55 = vmul.f32 %v215_v52, %v737_v1 }
  0x2f   : > { %v191_v56 = vsub.f32 %v159_v53, %v189_v50  ;;  %v225_v59 = vrot.slane %v217_v55, %v771_v15  ;;  %v358_v50 = vmul.f32 %v356_v48, %v732_v0 }
  0x31   : > { %v194_v60 = vsub.f32 %v191_v56, %v192_v54  ;;  %v226_v61 = vcombine.high %v225_v59, %v225_v59  ;;  %v233_v19 = vrot.slane %v225_v59, %v771_v15 }
  0x33   : > { %v205_v63 = vsub.f32 %v194_v60, %v203_v57  ;;  %v240_v4 = vrot.slane %v226_v61, %v771_v15  ;;  %v286_v27 = vcombine.high %v233_v19, %v233_v19 }
  0x35   : > { %v209_v3 = vmul.f32 %v205_v63, %v737_v1  ;;  %v812_v5 = vrot.slane %v205_v63, %v767_v13  ;;  %v346_v45 = vcombine.high %v240_v4, %v240_v4 }
  0x37   : > { %v210_v6 = vsub.f32 %v208_v2, %v209_v3  ;;  %v260_v8 = vmul.f32 %v812_v5, %v737_v1 }
  0x39   : > { %v242_v9 = vsub.f32 %v210_v6, %v240_v4  ;;  %v268_v12 = vrot.slane %v260_v8, %v771_v15  ;;  %v401_v4 = vmul.f32 %v399_v62, %v732_v0 }
  0x3b   : > { %v245_v16 = vsub.f32 %v242_v9, %v243_v7  ;;  %v269_v17 = vcombine.high %v268_v12, %v268_v12  ;;  %v276_v36 = vrot.slane %v268_v12, %v771_v15 }
  0x3d   : > { %v248_v20 = vsub.f32 %v245_v16, %v246_v10  ;;  %v283_v23 = vrot.slane %v269_v17, %v771_v15  ;;  %v343_v40 = vcombine.high %v276_v36, %v276_v36 }
  0x3f   : > { %v252_v22 = vmul.f32 %v248_v20, %v737_v1  ;;  %v825_v25 = vrot.slane %v248_v20, %v767_v13  ;;  %v396_v60 = vcombine.high %v283_v23, %v283_v23  ;;  %v442_v20 = vcombine.high %v356_v48, %v356_v48 }
  0x41   : > { %v253_v26 = vsub.f32 %v251_v21, %v252_v22  ;;  %v317_v28 = vmul.f32 %v825_v25, %v737_v1  ;;  %v444_v22 = vmul.f32 %v442_v20, %v732_v0 }
  0x43   : > { %v285_v14 = vsub.f32 %v253_v26, %v283_v23  ;;  %v325_v31 = vrot.slane %v317_v28, %v771_v15 }
  0x45   : > { %v288_v32 = vsub.f32 %v285_v14, %v286_v27  ;;  %v326_v33 = vcombine.high %v325_v31, %v325_v31  ;;  %v333_v53 = vrot.slane %v325_v31, %v771_v15  ;;  %v491_v14 = vsel %vm490_vm0, %v795_v46, %v812_v5 }
  0x46   : > { %v493_v31 = vsel %vm492_vm1, %v491_v14, %v825_v25 }
  0x47   : > { %v291_v34 = vsub.f32 %v288_v32, %v289_v29  ;;  %v340_v38 = vrot.slane %v326_v33, %v771_v15  ;;  %v393_v57 = vcombine.high %v333_v53, %v333_v53 }
  0x49   : > { %v309_v37 = vmul.f32 %v291_v34, %v737_v1  ;;  %v365_v41 = vrot.slane %v291_v34, %v767_v13  ;;  %v439_v18 = vcombine.high %v340_v38, %v340_v38 }
  0x4b   : > { %v310_v39 = vsub.f32 %v308_v35, %v309_v37  ;;  %v367_v47 = vmul.f32 %v365_v41, %v737_v1  ;;  %v495_v34 = vsel %vm494_vm2, %v493_v31, %v365_v41 }
  0x4d   : > { %v342_v42 = vsub.f32 %v310_v39, %v340_v38  ;;  %v375_v49 = vrot.slane %v367_v47, %v771_v15 }
  0x4f   : > { %v345_v44 = vsub.f32 %v342_v42, %v343_v40  ;;  %v376_v52 = vcombine.high %v375_v49, %v375_v49  ;;  %v383_v8 = vrot.slane %v375_v49, %v771_v15 }
  0x51   : > { %v838_v2 = vsub.f32 %v345_v44, %v346_v45   ;;  %v390_v55 = vrot.slane %v376_v52, %v771_v15  ;;  %v436_v12 = vcombine.high %v383_v8, %v383_v8 }
  0x53   : > { %v359_v51 = vmul.f32 %v838_v2, %v737_v1  ;;  %v408_v58 = vrot.slane %v838_v2, %v767_v13  ;;  %v475_v33 = vcombine.high %v390_v55, %v390_v55 }
  0x55   : > { %v360_v54 = vsub.f32 %v358_v50, %v359_v51  ;;  %v410_v61 = vmul.f32 %v408_v58, %v737_v1  ;;  %v497_v35 = vsel %vm496_vm3, %v495_v34, %v408_v58 }
  0x57   : > { %v392_v56 = vsub.f32 %v360_v54, %v390_v55  ;;  %v418_v63 = vrot.slane %v410_v61, %v771_v15 }
  0x59   : > { %v395_v59 = vsub.f32 %v392_v56, %v393_v57  ;;  %v419_v7 = vcombine.high %v418_v63, %v418_v63  ;;  %v426_v26 = vrot.slane %v418_v63, %v771_v15 }
  0x5b   : > { %v398_v3 = vsub.f32 %v395_v59, %v396_v60   ;;  %v433_v10 = vrot.slane %v419_v7, %v771_v15  ;;  %v472_v30 = vcombine.high %v426_v26, %v426_v26 }
  0x5d   : > { %v402_v6 = vmul.f32 %v398_v3, %v737_v1  ;;  %v451_v16 = vrot.slane %v398_v3, %v767_v13 }
  0x5f   : > { %v403_v9 = vsub.f32 %v401_v4, %v402_v6  ;;  %v453_v19 = vmul.f32 %v451_v16, %v737_v1 }
  0x61   : > { %v435_v11 = vsub.f32 %v403_v9, %v433_v10  ;;  %v461_v21 = vrot.slane %v453_v19, %v771_v15 }
  0x63   : > { %v438_v17 = vsub.f32 %v435_v11, %v436_v12  ;;  %v462_v24 = vcombine.high %v461_v21, %v461_v21 }
  0x65   : > { %v441_v4 = vsub.f32 %v438_v17, %v439_v18   ;;  %v469_v28 = vrot.slane %v462_v24, %v771_v15  ;;  %v499_v15 = vsel %vm498_vm4, %v497_v35, %v451_v16 }
  0x67   : > { %v445_v23 = vmul.f32 %v441_v4, %v737_v1  ;;  %v482_v36 = vrot.slane %v441_v4, %v767_v13 }
  0x69   : > { %v446_v27 = vsub.f32 %v444_v22, %v445_v23  ;;  %v501_v46 = vsel %vm500_vm5, %v499_v15, %v482_v36 }
  0x6b   : > { %v471_v29 = vsub.f32 %v446_v27, %v469_v28 }
  0x6d   : > { %v474_v32 = vsub.f32 %v471_v29, %v472_v30 }
  0x6f   : > { %v477_v5 = vsub.f32 %v474_v32, %v475_v33  }
  0x71   : > { %v488_v37 = vrot.slane %v477_v5, %v767_v13 }
  0x73   : > { %v503_v38 = vsel %vm502_vm6, %v501_v46, %v488_v37 }
  0x94   :  { %36 = sbr.rel (!%p34_p8) target bundleno = 21 (0x15), region = 50 }
  0x97   : > { %v507_v39 = vpop.permute.xlu0 %506 }
  0x98   : > { %v509_v40 = vmul.f32 %v507_v39, %v503_v38 }
  0x9a   : > { %511 = vst [vmem:[%s510_s10] sm:$0xff] %v509_v40 }
  0x9b   :  { %634 = shalt.err (!%p631_p13)
}
  0x9c   :  { %s635_s16 = scalar_lea.hbm %s895_s4, 512 }
  0x9d   :  { %p636_p0 = scmp.ne.s32.totalorder %s895_s4, %s635_s16  ;;  %p639_p1 = scmp.lt.u32.totalorder %s635_s16, %s895_s4 }
  0x9f   :  { %p641_p2 = pnand %p639_p1, %p636_p0 }
  0xa1   :  { %644 = shalt.err (!%p641_p2)
}
  0xa2   :  { %s693_s0 = smov 128   ;;  %s694_s3 = smov 8  }
  0xa3   :  { %523 = dma.vmem_to_hbm [thread:$0]  %s518_s12, 512, %s895_s4, [#allocation4], %s693_s0, %s693_s0, %s694_s3  }
  0xa4   :  { %667 = dma.done.wait [#allocation4], 512  }
  0xa5   :  { %668 = vsyncadd [#allocation4], 4294966784 }
  0xa6   :  { %527 = vsyncpa [#allocation3], 1 }
  0xa7   :  { %528 = vsyncpa [#allocation4], 1 }

</bundles_post_ra>
